<compile_context>
chip_gen: v5e
topology: v5e:2x2
jax: 0.10.0
libtpu: 0.0.40
codegen_flags: <defaults>
</compile_context>

<pallas_src>
import jax
import jax.numpy as jnp
from jax.experimental import pallas as pl
from jax.experimental.pallas import tpu as pltpu


def _round_up(x, m):
    return ((x + m - 1) // m) * m


def mlp3_kernel(x_ref, w_ref, b_ref, o_ref):
    x = x_ref[...].astype(jnp.float32)      # (TILE_B, n_mlp)  batch on sublanes
    w = w_ref[...].astype(jnp.float32)      # (2, n_mlp)       PyTorch (out, in) layout
    b = b_ref[...].astype(jnp.float32)      # (2, 1)

    # logits^T = W @ X^T  ->  (2, TILE_B): contract both operands on their
    # last (feature) axis so batch lands on the lane axis (lane-dense).
    logits = jax.lax.dot_general(
        w, x, (((1,), (1,)), ((), ())),
        preferred_element_type=jnp.float32) + b          # (2, TILE_B)

    # LeakyReLU (PyTorch default negative_slope = 0.01)
    act = jnp.where(logits >= 0.0, logits, 0.01 * logits)

    # Two-class softmax == sigmoid of the logit difference (no XLU reductions,
    # exp on the EUP; exact complement keeps rows summing to 1).
    e = jnp.exp(act[1:2, :] - act[0:1, :])               # (1, TILE_B)
    p0 = 1.0 / (1.0 + e)
    p1 = 1.0 - p0

    # Lane-dense stores (full 128-lane vst's).
    o_ref[0:1, :] = p0.astype(o_ref.dtype)
    o_ref[1:2, :] = p1.astype(o_ref.dtype)


def mlp3_forward(x, w, b, *, max_tile_b=1024):
    """x: (B, n_mlp), w: (2, n_mlp) [PyTorch Linear layout], b: (2,) -> (B, 2)."""
    B, n_mlp = x.shape
    assert w.shape == (2, n_mlp) and b.shape == (2,)

    # Tile the batch: TILE_B is a multiple of 128 (lane-dense out block),
    # capped so 2 x (TILE_B x n_mlp) double-buffered f32 tiles stay tiny in VMEM.
    tile_b = min(max_tile_b, _round_up(max(B, 1), 128))
    b_pad = _round_up(B, tile_b)
    num_tiles = b_pad // tile_b

    x_p = x if b_pad == B else jnp.pad(x, ((0, b_pad - B), (0, 0)))
    b2 = b.reshape(2, 1)

    itemsize = jnp.dtype(x.dtype).itemsize
    cost = pl.CostEstimate(
        flops=int(2 * b_pad * n_mlp * 2 + 8 * b_pad),
        transcendentals=int(b_pad),
        bytes_accessed=int(b_pad * n_mlp * itemsize      # x
                           + 2 * b_pad * itemsize        # out
                           + (2 * n_mlp + 2) * 4),       # w, b
    )

    out_t = pl.pallas_call(
        mlp3_kernel,
        out_shape=jax.ShapeDtypeStruct((2, b_pad), x.dtype),
        grid=(num_tiles,),
        in_specs=[
            pl.BlockSpec((tile_b, n_mlp), lambda i: (i, 0)),   # x tile
            pl.BlockSpec((2, n_mlp), lambda i: (0, 0)),        # full weight
            pl.BlockSpec((2, 1), lambda i: (0, 0)),            # bias
        ],
        out_specs=pl.BlockSpec((2, tile_b), lambda i: (0, i)),
        compiler_params=pltpu.CompilerParams(
            dimension_semantics=("parallel",)),
        cost_estimate=cost,
    )(x_p, w, b2)

    # (2, B_pad) -> (B, 2): cheap wrapper-side layout plumbing.
    return out_t.T[:B]


def reference_forward(x, w, b):
    logits = x @ w.T + b[None, :]
    act = jnp.where(logits >= 0.0, logits, 0.01 * logits)
    return jax.nn.softmax(act, axis=1)


if __name__ == "__main__":
    key = jax.random.PRNGKey(0)
    k_x, k_w, k_b = jax.random.split(key, 3)

    batch = 8
    n_mlp = 32  # hidden size feeding the MLP_3 head

    x = jax.random.normal(k_x, (batch, n_mlp), dtype=jnp.float32)

    # Deterministic parameter init matching PyTorch Linear's
    # U(-1/sqrt(fan_in), 1/sqrt(fan_in)); weight kept in (out, in) layout.
    bound = 1.0 / jnp.sqrt(jnp.float32(n_mlp))
    w = jax.random.uniform(k_w, (2, n_mlp), dtype=jnp.float32,
                           minval=-bound, maxval=bound)
    b = jax.random.uniform(k_b, (2,), dtype=jnp.float32,
                           minval=-bound, maxval=bound)

    out = mlp3_forward(x, w, b)
    out = jax.block_until_ready(out)

    ref = reference_forward(x, w, b)
    assert out.shape == (batch, 2)
    assert jnp.allclose(out, ref, atol=1e-5, rtol=1e-5), "mismatch vs reference"
    assert jnp.allclose(jnp.sum(out, axis=1), jnp.ones((batch,)), atol=1e-5)

    print("KERNEL_OK")
</pallas_src>

<mosaic_0001>
module attributes {stable_mosaic.version = 11 : i64} {
  func.func @mlp3_kernel(%arg0: i32, %arg1: memref<128x32xf32, #tpu.memory_space<vmem>>, %arg2: memref<2x32xf32, #tpu.memory_space<vmem>>, %arg3: memref<2x1xf32, #tpu.memory_space<vmem>>, %arg4: memref<2x128xf32, #tpu.memory_space<vmem>>) attributes {dimension_semantics = [#tpu.dimension_semantics<parallel>], iteration_bounds = array<i64: 1>, scalar_prefetch = 0 : i64, scratch_operands = 0 : i64, tpu.core_type = #tpu.core_type<tc>, window_params = [{transform_indices = @transform_0, window_bounds = array<i64: 128, 32>}, {pipeline_mode = #tpu.pipeline_mode<synchronous>, transform_indices = @transform_1, window_bounds = array<i64: 2, 32>}, {pipeline_mode = #tpu.pipeline_mode<synchronous>, transform_indices = @transform_2, window_bounds = array<i64: 2, 1>}, {transform_indices = @transform_3, window_bounds = array<i64: 2, 128>}]} {
    %c0 = arith.constant 0 : index
    %c0_0 = arith.constant 0 : index
    %0 = vector.load %arg1[%c0, %c0_0] : memref<128x32xf32, #tpu.memory_space<vmem>>, vector<128x32xf32>
    %c0_1 = arith.constant 0 : index
    %c0_2 = arith.constant 0 : index
    %1 = vector.load %arg2[%c0_1, %c0_2] : memref<2x32xf32, #tpu.memory_space<vmem>>, vector<2x32xf32>
    %c0_3 = arith.constant 0 : index
    %c0_4 = arith.constant 0 : index
    %2 = vector.load %arg3[%c0_3, %c0_4] : memref<2x1xf32, #tpu.memory_space<vmem>>, vector<2x1xf32>
    %cst = arith.constant dense<0.000000e+00> : vector<2x128xf32>
    %3 = tpu.matmul %1, %0, %cst {dimension_numbers = #tpu.dot_dimension_numbers<[1], [1], [0], [0], [0, 0, 1, 0], [], []>} : vector<2x32xf32>, vector<128x32xf32>, vector<2x128xf32> -> vector<2x128xf32>
    %4 = vector.broadcast %2 : vector<2x1xf32> to vector<2x128xf32>
    %5 = arith.addf %3, %4 : vector<2x128xf32>
    %cst_5 = arith.constant 0.000000e+00 : f32
    %6 = vector.broadcast %cst_5 : f32 to vector<2x128xf32>
    %7 = arith.cmpf oge, %5, %6 : vector<2x128xf32>
    %cst_6 = arith.constant 0.00999999977 : f32
    %8 = vector.broadcast %cst_6 : f32 to vector<2x128xf32>
    %9 = arith.mulf %8, %5 : vector<2x128xf32>
    %10 = arith.select %7, %5, %9 : vector<2x128xi1>, vector<2x128xf32>
    %11 = vector.extract_strided_slice %10 {offsets = [1, 0], sizes = [1, 128], strides = [1, 1]} : vector<2x128xf32> to vector<1x128xf32>
    %12 = vector.extract_strided_slice %10 {offsets = [0, 0], sizes = [1, 128], strides = [1, 1]} : vector<2x128xf32> to vector<1x128xf32>
    %13 = arith.subf %11, %12 : vector<1x128xf32>
    %14 = math.exp %13 : vector<1x128xf32>
    %cst_7 = arith.constant 1.000000e+00 : f32
    %15 = vector.broadcast %cst_7 : f32 to vector<1x128xf32>
    %16 = arith.addf %15, %14 : vector<1x128xf32>
    %cst_8 = arith.constant 1.000000e+00 : f32
    %17 = vector.broadcast %cst_8 : f32 to vector<1x128xf32>
    %18 = arith.divf %17, %16 : vector<1x128xf32>
    %cst_9 = arith.constant 1.000000e+00 : f32
    %19 = vector.broadcast %cst_9 : f32 to vector<1x128xf32>
    %20 = arith.subf %19, %18 : vector<1x128xf32>
    %c0_10 = arith.constant 0 : index
    %c0_11 = arith.constant 0 : index
    %21 = vector.load %arg4[%c0_10, %c0_11] : memref<2x128xf32, #tpu.memory_space<vmem>>, vector<1x128xf32>
    tpu.vector_store %arg4[%c0_10, %c0_11], %18 {strides = array<i32>} : memref<2x128xf32, #tpu.memory_space<vmem>>, vector<1x128xf32>,
    %c1 = arith.constant 1 : index
    %c0_12 = arith.constant 0 : index
    %22 = vector.load %arg4[%c1, %c0_12] : memref<2x128xf32, #tpu.memory_space<vmem>>, vector<1x128xf32>
    tpu.vector_store %arg4[%c1, %c0_12], %20 {strides = array<i32>} : memref<2x128xf32, #tpu.memory_space<vmem>>, vector<1x128xf32>,
    return
  }
  func.func @transform_0(%arg0: i32) -> (i32, i32) {
    %c0_i32 = arith.constant 0 : i32
    %c0_i32_0 = arith.constant 0 : i32
    return %arg0, %c0_i32 : i32, i32
  }
  func.func @transform_1(%arg0: i32) -> (i32, i32) {
    %c0_i32 = arith.constant 0 : i32
    %c0_i32_0 = arith.constant 0 : i32
    %c0_i32_1 = arith.constant 0 : i32
    return %c0_i32, %c0_i32_0 : i32, i32
  }
  func.func @transform_2(%arg0: i32) -> (i32, i32) {
    %c0_i32 = arith.constant 0 : i32
    %c0_i32_0 = arith.constant 0 : i32
    %c0_i32_1 = arith.constant 0 : i32
    return %c0_i32, %c0_i32_0 : i32, i32
  }
  func.func @transform_3(%arg0: i32) -> (i32, i32) {
    %c0_i32 = arith.constant 0 : i32
    %c0_i32_0 = arith.constant 0 : i32
    return %c0_i32, %arg0 : i32, i32
  }
}

</mosaic_0001>

<bundles_post_ra>
// kernel: tpu_custom_call.1
= control target key start
LH: loop header
LB: loop body
LE: loop exit
PB: predicated region body
PF: predicated region fallthrough
CT: control target
= control target key end

     0   :  { %vm38_vm0 = vcmask 261120   ;;  %s300_s0 = inlined_call_operand.vmem [shape: f32[128,32], index: 0, kind: input, shape index: {}]   ;;  %s301_s1 = inlined_call_operand.vmem [shape: f32[2,32], index: 1, kind: input, shape index: {}]   ;;  %s302_s2 = inlined_call_operand.vmem [shape: f32[2,1], index: 2, kind: input, shape index: {}]   ;;  %s303_s3 = inlined_call_operand.hbm [shape: f32[2,128], index: 3, kind: output, shape index: {}]  }
   0x1   :  { %v30_v0 = vld [vmem:[%s300_s0 + $0x78] sm:$0xff]  ;;  %v29_v1 = vld [vmem:[%s300_s0 + $0x70] sm:$0xff] }
   0x2   :  { %154 = vmatpush.xpose.msk.msra.mxu0 %vm38_vm0, %v30_v0 }
   0x3   :  { %8 = vsyncpa [#allocation3], 0  ;;  %v28_v2 = vld [vmem:[%s300_s0 + $0x68] sm:$0xff]  ;;  %v27_v3 = vld [vmem:[%s300_s0 + $0x60] sm:$0xff]  ;;  %v204_v10 = vmov 0   ;;  %s145_s22 = sshll.u32 %s303_s3, 4  ;;  %s146_s22 = int_to_ptr.hbm [resolvable:$true] %s145_s22 }
   0x4   :  { %v26_v4 = vld [vmem:[%s300_s0 + $0x58] sm:$0xff]  ;;  %v25_v5 = vld [vmem:[%s300_s0 + $0x50] sm:$0xff]  ;;  %v24_v6 = vld [vmem:[%s300_s0 + $0x48] sm:$0xff]  ;;  %173 = vset.pattern.permute.xlu0 %v204_v10 }
   0x5   :  { %v23_v7 = vld [vmem:[%s300_s0 + $0x40] sm:$0xff]  ;;  %v22_v8 = vld [vmem:[%s300_s0 + $0x38] sm:$0xff]  ;;  %v21_v11 = vld [vmem:[%s300_s0 + $0x30] sm:$0xff] }
   0x6   :  { %155 = vmatpush.xpose.msk.msra.mxu0 %vm38_vm0, %v29_v1  ;;  %v32_v9 = vld [vmem:[%s302_s2] sm:$0x3]  ;;  %v20_v12 = vld [vmem:[%s300_s0 + $0x28] sm:$0xff]  ;;  %v18_v14 = vld [vmem:[%s300_s0 + $0x18] sm:$0xff] }
   0x7   :  { %35 = vperm.xlu0 %173, %v32_v9   ;;  %v19_v13 = vld [vmem:[%s300_s0 + $0x20] sm:$0xff]  ;;  %v17_v15 = vld [vmem:[%s300_s0 + $0x10] sm:$0xff]  ;;  %v16_v16 = vld [vmem:[%s300_s0 + $0x8] sm:$0xff] }
   0x8   :  { %v15_v17 = vld [vmem:[%s300_s0] sm:$0xff]  ;;  %s205_s0 = smov [#allocation2]  }
   0x9   :  { %v31_v18 = vld [vmem:[%s301_s1] sm:$0x3]  ;;  %s143_s1 = sshll.u32 %s205_s0, 4  ;;  %s144_s1 = int_to_ptr.vmem [resolvable:$true] %s143_s1 }
   0xa   :  { %156 = vmatpush.xpose.msk.msra.mxu0 %vm38_vm0, %v28_v2 }
   0xe   :  { %157 = vmatpush.xpose.msk.msra.mxu0 %vm38_vm0, %v27_v3 }
  0x12   :  { %158 = vmatpush.xpose.msk.msra.mxu0 %vm38_vm0, %v26_v4 }
  0x16   :  { %159 = vmatpush.xpose.msk.msra.mxu0 %vm38_vm0, %v25_v5 }
  0x1a   :  { %160 = vmatpush.xpose.msk.msra.mxu0 %vm38_vm0, %v24_v6 }
  0x1e   :  { %161 = vmatpush.xpose.msk.msra.mxu0 %vm38_vm0, %v23_v7 }
  0x22   :  { %162 = vmatpush.xpose.msk.msra.mxu0 %vm38_vm0, %v22_v8 }
  0x26   :  { %163 = vmatpush.xpose.msk.msra.mxu0 %vm38_vm0, %v21_v11 }
  0x2a   :  { %164 = vmatpush.xpose.msk.msra.mxu0 %vm38_vm0, %v20_v12 }
  0x2e   :  { %165 = vmatpush.xpose.msk.msra.mxu0 %vm38_vm0, %v19_v13 }
  0x32   :  { %166 = vmatpush.xpose.msk.msra.mxu0 %vm38_vm0, %v18_v14 }
  0x36   :  { %167 = vmatpush.xpose.msk.msra.mxu0 %vm38_vm0, %v17_v15 }
  0x3a   :  { %168 = vmatpush.xpose.msk.msra.mxu0 %vm38_vm0, %v16_v16 }
  0x3e   :  { %169 = vmatpush.xpose.msk.msra.mxu0 %vm38_vm0, %v15_v17 }
  0x41   :  { %170 = vmatmul.msk.f32.vlgmr.msra.gmra.mxu0 %vm38_vm0, %v31_v18 }
  0x79   :  { %v36_v19 = vpop.permute.xlu0 %35 }
  0xbe   :  { %v107_v20 = vpop.f32.mrf.mxu0 }
  0xbf   :  { %v108_v21 = vadd.f32 %v107_v20, %v36_v19 }
  0xc1   :  { %vm110_vm1 = vcmp.ge.f32.partialorder %v108_v21, 0.0  ;;  %v111_v22 = vmul.f32 0.01, %v108_v21 }
  0xc3   :  { %v112_v23 = vsel %vm110_vm1, %v108_v21, %v111_v22 }
  0xc4   :  { %v114_v24 = vrot.slane %v112_v23, 7 }
  0xc6   :  { %v116_v25 = vsub.f32 %v112_v23, %v114_v24 }
  0xc8   :  { %v117_v26 = vmul.f32 1.442695, %v116_v25 }
  0xca   :  { %174 = vpow2.f32 %v117_v26 }
  0xd0   :  { %v175_v27 = vpop.eup %174 }
  0xd1   :  { %v119_v28 = vadd.f32 1.0, %v175_v27 }
  0xd3   :  { %176 = vrcp.f32 %v119_v28  ;;  %v131_v32 = vand.u32 2147483648, %v119_v28  ;;  %v129_v34 = vand.u32 2147483647, %v119_v28  ;;  %vm125_vm3 = vweird.f32 %v119_v28 }
  0xd5   :  { %v132_v36 = vor.u32 1.1754944e-38, %v131_v32  ;;  %vm130_vm5 = vcmp.eq.f32.partialorder %v129_v34, 8.507059e+37 }
  0xd9   :  { %v177_v29 = vpop.eup %176 }
  0xda   :  { %v121_v30 = vmul.f32 %v177_v29, %v119_v28  ;;  %vm126_vm2 = vweird.f32 %v177_v29 }
  0xdb   :  { %vm127_vm4 = vmor %vm125_vm3, %vm126_vm2 }
  0xdc   :  { %v122_v31 = vsub.f32 1.0, %v121_v30 }
  0xde   :  { %v123_v33 = vmul.f32 %v177_v29, %v122_v31 }
  0xe0   :  { %v124_v35 = vadd.f32 %v177_v29, %v123_v33 }
  0xe2   :  { %v128_v37 = vsel %vm127_vm4, %v177_v29, %v124_v35 }
  0xe3   :  { %v133_v38 = vsel %vm130_vm5, %v132_v36, %v128_v37 }
  0xe4   :  { %v135_v39 = vsub.f32 1.0, %v133_v38  ;;  %136 = vst [vmem:[#allocation2 - $0x1] sm:$0x2] %v133_v38 }
  0xe6   :  { %137 = vst [vmem:[#allocation2] sm:$0x2] %v135_v39 }
  0xe7   :  { %148 = dma.vmem_to_hbm [thread:$0]  %s144_s1, 32, %s146_s22, [#allocation3]  }
  0xe8   :  { %202 = dma.done.wait [#allocation3], 32  }
  0xe9   :  { %203 = vsyncadd [#allocation3], 4294967264 }
  0xea   :  { %153 = vsyncpa [#allocation3], 1 }

</bundles_post_ra>
